<compile_context>
chip_gen: v7x
topology: tpu7x:2x2x1
jax: 0.10.0
libtpu: 0.0.40
codegen_flags: <defaults>
</compile_context>

<pallas_src>
import functools
import math

import jax
import jax.numpy as jnp
from jax.experimental import pallas as pl
from jax.experimental.pallas import tpu as pltpu


# ----------------------------------------------------------------------------
# Fused whole-network kernel
# ----------------------------------------------------------------------------
def _upscale_net_x1_kernel(x_ref,
                           w1a_ref, w2a_ref, wsa_ref, afa_ref,
                           w1b_ref, w2b_ref, wsb_ref, afb_ref,
                           w1c_ref, w2c_ref, wsc_ref, afc_ref,
                           fin_aff_ref, fin_w_ref, fin_b_ref,
                           o_ref, *, length, batch_tile, slope):
    f32 = jnp.float32
    lpad = length + 2
    width = batch_tile * lpad
    cin = x_ref.shape[1]

    # --- lane-dense, zero-padded input slab: (Cin, batch_tile*(L+2)) ---------
    zc_in = jnp.zeros((cin, 1), f32)
    parts = []
    for b in range(batch_tile):                       # static unroll
        parts += [zc_in, x_ref[b].astype(f32), zc_in]
    act = jnp.concatenate(parts, axis=1)

    # --- interior mask: 1.0 on real samples, 0.0 on per-batch pad columns ----
    mrow = [jnp.zeros((1, 1), f32), jnp.ones((1, length), f32),
            jnp.zeros((1, 1), f32)]
    mask = jnp.concatenate(mrow * batch_tile, axis=1)            # (1, width)

    def lrelu(v):
        return jnp.where(v >= 0.0, v, v * slope)

    def shifted(a, d):
        # d == -1: column i <- a[:, i-1] ; d == +1: column i <- a[:, i+1]
        zc = jnp.zeros((a.shape[0], 1), f32)
        if d < 0:
            return jnp.concatenate([zc, a[:, :width - 1]], axis=1)
        return jnp.concatenate([a[:, 1:], zc], axis=1)

    def conv3(a, w_ref, scale, shift):
        # im2col: one MXU matmul, contraction dim = 3 * C_in.
        cols = jnp.concatenate([shifted(a, -1), a, shifted(a, +1)], axis=0)
        y = jnp.dot(w_ref[...].astype(f32), cols, preferred_element_type=f32)
        if scale is not None:
            y = y * scale
        return y + shift

    def block(a, w1_ref, w2_ref, ws_ref, af_ref):
        aff = af_ref[...].astype(f32)
        s1, t1 = aff[:, 0:1], aff[:, 1:2]     # bn1 folded (+ conv1 bias)
        s2, t2 = aff[:, 2:3], aff[:, 3:4]     # bn2 folded (+ conv2 bias)
        bs = aff[:, 4:5]                      # 1x1 shortcut bias
        identity = jnp.dot(ws_ref[...].astype(f32), a,
                           preferred_element_type=f32) + bs
        h = lrelu(conv3(a, w1_ref, s1, t1)) * mask
        return lrelu(conv3(h, w2_ref, s2, t2) + identity) * mask

    act = block(act, w1a_ref, w2a_ref, wsa_ref, afa_ref)   # inch   -> 4*inch
    act = block(act, w1b_ref, w2b_ref, wsb_ref, afb_ref)   # 4*inch -> 2*inch
    act = block(act, w1c_ref, w2c_ref, wsc_ref, afc_ref)   # 2*inch -> inch

    # --- final: BN (input affine, pad cols re-zeroed) -> conv3 -> LeakyReLU --
    fa = fin_aff_ref[...].astype(f32)
    act = (act * fa[:, 0:1] + fa[:, 1:2]) * mask
    y = lrelu(conv3(act, fin_w_ref, None, fin_b_ref[...].astype(f32)))

    # --- crop the per-batch interiors out of the lane-dense slab -------------
    for b in range(batch_tile):                       # static unroll
        o_ref[b] = y[:, b * lpad + 1: b * lpad + 1 + length].astype(o_ref.dtype)


# ----------------------------------------------------------------------------
# Parameter construction / folding (plain-JAX glue, runs once per call)
# ----------------------------------------------------------------------------
def _conv_params(key, cout, cin, ksize):
    kw, kb = jax.random.split(key)
    bound = 1.0 / math.sqrt(cin * ksize)
    w = jax.random.uniform(kw, (cout, cin, ksize), jnp.float32, -bound, bound)
    b = jax.random.uniform(kb, (cout,), jnp.float32, -bound, bound)
    return w, b


def _bn_params(key, c):
    k1, k2, k3, k4 = jax.random.split(key, 4)
    gamma = jax.random.uniform(k1, (c,), jnp.float32, 0.5, 1.5)
    beta = 0.1 * jax.random.normal(k2, (c,), jnp.float32)
    mean = 0.1 * jax.random.normal(k3, (c,), jnp.float32)
    var = jax.random.uniform(k4, (c,), jnp.float32, 0.5, 1.5)
    return gamma, beta, mean, var


def _bn_fold(gamma, beta, mean, var, eps=1e-5):
    scale = gamma / jnp.sqrt(var + eps)
    shift = beta - mean * scale
    return scale, shift


def _wflat(w):
    # (Cout, Cin, K) -> (Cout, K*Cin); column block k holds W[:, :, k].
    cout, cin, k = w.shape
    return jnp.transpose(w, (0, 2, 1)).reshape(cout, k * cin).astype(jnp.float32)


def _fold_block(p):
    s1, t1 = _bn_fold(*p['bn1'])
    s2, t2 = _bn_fold(*p['bn2'])
    aff = jnp.stack([s1, t1 + s1 * p['b1'],
                     s2, t2 + s2 * p['b2'],
                     p['bs']], axis=1).astype(jnp.float32)       # (Cout, 5)
    return (_wflat(p['w1']), _wflat(p['w2']),
            p['ws'][:, :, 0].astype(jnp.float32), aff)


def make_block_params(key, cin, cout):
    ks = jax.random.split(key, 5)
    w1, b1 = _conv_params(ks[0], cout, cin, 3)
    w2, b2 = _conv_params(ks[1], cout, cout, 3)
    ws, bs = _conv_params(ks[2], cout, cin, 1)
    return dict(w1=w1, b1=b1, bn1=_bn_params(ks[3], cout),
                w2=w2, b2=b2, bn2=_bn_params(ks[4], cout),
                ws=ws, bs=bs)


def make_net_params(key, inch=8, outch=8):
    ks = jax.random.split(key, 5)
    return dict(
        block1=make_block_params(ks[0], inch, inch * 4),
        block2=make_block_params(ks[1], inch * 4, inch * 2),
        block3=make_block_params(ks[2], inch * 2, inch),
        bn=_bn_params(ks[3], inch),
        conv=_conv_params(ks[4], outch, inch, 3),
    )


# ----------------------------------------------------------------------------
# Forward pass: ONE pallas_call for the whole network
# ----------------------------------------------------------------------------
def upscale_net_x1(x, params, *, batch_tile=None):
    n, cin, length = x.shape
    lpad = length + 2
    outch = params['conv'][0].shape[0]

    # Batch tile: keep the lane axis (batch_tile*(L+2)) as dense as possible
    # while letting larger batches shard across TensorCores via the grid.
    if batch_tile is None:
        batch_tile = max(1, min(n, 128 // lpad))
    while n % batch_tile:
        batch_tile -= 1
    grid = (n // batch_tile,)

    args = [x]
    in_specs = [pl.BlockSpec((batch_tile, cin, length), lambda g: (g, 0, 0))]
    for blk in ('block1', 'block2', 'block3'):
        for arr in _fold_block(params[blk]):
            args.append(arr)
            in_specs.append(pl.BlockSpec(arr.shape, lambda g: (0, 0)))

    sbn, tbn = _bn_fold(*params['bn'])
    fin_aff = jnp.stack([sbn, tbn], axis=1).astype(jnp.float32)   # (inch, 2)
    wc, bc = params['conv']
    fin_w = _wflat(wc)
    fin_b = bc.reshape(-1, 1).astype(jnp.float32)
    for arr in (fin_aff, fin_w, fin_b):
        args.append(arr)
        in_specs.append(pl.BlockSpec(arr.shape, lambda g: (0, 0)))

    kernel = functools.partial(_upscale_net_x1_kernel,
                               length=length, batch_tile=batch_tile, slope=0.1)

    return pl.pallas_call(
        kernel,
        out_shape=jax.ShapeDtypeStruct((n, outch, length), x.dtype),
        grid=grid,
        in_specs=in_specs,
        out_specs=pl.BlockSpec((batch_tile, outch, length), lambda g: (g, 0, 0)),
        compiler_params=pltpu.CompilerParams(dimension_semantics=("parallel",)),
    )(*args)


if __name__ == "__main__":
    inch, outch = 8, 8
    batch, length = 2, 16

    key = jax.random.PRNGKey(0)
    k_params, k_x = jax.random.split(key)
    params = make_net_params(k_params, inch=inch, outch=outch)
    x = jax.random.normal(k_x, (batch, inch, length), jnp.float32)

    y = jax.jit(upscale_net_x1)(x, params)
    jax.block_until_ready(y)

    assert y.shape == (batch, outch, length), y.shape
    assert bool(jnp.all(jnp.isfinite(y)))
    print("KERNEL_OK")
</pallas_src>

<mosaic_0001>
module attributes {stable_mosaic.version = 11 : i64} {
  func.func @_upscale_net_x1_kernel(%arg0: i32, %arg1: memref<2x8x16xf32, #tpu.memory_space<vmem>>, %arg2: memref<32x24xf32, #tpu.memory_space<vmem>>, %arg3: memref<32x96xf32, #tpu.memory_space<vmem>>, %arg4: memref<32x8xf32, #tpu.memory_space<vmem>>, %arg5: memref<32x5xf32, #tpu.memory_space<vmem>>, %arg6: memref<16x96xf32, #tpu.memory_space<vmem>>, %arg7: memref<16x48xf32, #tpu.memory_space<vmem>>, %arg8: memref<16x32xf32, #tpu.memory_space<vmem>>, %arg9: memref<16x5xf32, #tpu.memory_space<vmem>>, %arg10: memref<8x48xf32, #tpu.memory_space<vmem>>, %arg11: memref<8x24xf32, #tpu.memory_space<vmem>>, %arg12: memref<8x16xf32, #tpu.memory_space<vmem>>, %arg13: memref<8x5xf32, #tpu.memory_space<vmem>>, %arg14: memref<8x2xf32, #tpu.memory_space<vmem>>, %arg15: memref<8x24xf32, #tpu.memory_space<vmem>>, %arg16: memref<8x1xf32, #tpu.memory_space<vmem>>, %arg17: memref<2x8x16xf32, #tpu.memory_space<vmem>>) attributes {dimension_semantics = [#tpu.dimension_semantics<parallel>], iteration_bounds = array<i64: 1>, scalar_prefetch = 0 : i64, scratch_operands = 0 : i64, tpu.core_type = #tpu.core_type<tc>, window_params = [{transform_indices = @transform_0, window_bounds = array<i64: 2, 8, 16>}, {pipeline_mode = #tpu.pipeline_mode<synchronous>, transform_indices = @transform_1, window_bounds = array<i64: 32, 24>}, {pipeline_mode = #tpu.pipeline_mode<synchronous>, transform_indices = @transform_2, window_bounds = array<i64: 32, 96>}, {pipeline_mode = #tpu.pipeline_mode<synchronous>, transform_indices = @transform_3, window_bounds = array<i64: 32, 8>}, {pipeline_mode = #tpu.pipeline_mode<synchronous>, transform_indices = @transform_4, window_bounds = array<i64: 32, 5>}, {pipeline_mode = #tpu.pipeline_mode<synchronous>, transform_indices = @transform_5, window_bounds = array<i64: 16, 96>}, {pipeline_mode = #tpu.pipeline_mode<synchronous>, transform_indices = @transform_6, window_bounds = array<i64: 16, 48>}, {pipeline_mode = #tpu.pipeline_mode<synchronous>, transform_indices = @transform_7, window_bounds = array<i64: 16, 32>}, {pipeline_mode = #tpu.pipeline_mode<synchronous>, transform_indices = @transform_8, window_bounds = array<i64: 16, 5>}, {pipeline_mode = #tpu.pipeline_mode<synchronous>, transform_indices = @transform_9, window_bounds = array<i64: 8, 48>}, {pipeline_mode = #tpu.pipeline_mode<synchronous>, transform_indices = @transform_10, window_bounds = array<i64: 8, 24>}, {pipeline_mode = #tpu.pipeline_mode<synchronous>, transform_indices = @transform_11, window_bounds = array<i64: 8, 16>}, {pipeline_mode = #tpu.pipeline_mode<synchronous>, transform_indices = @transform_12, window_bounds = array<i64: 8, 5>}, {pipeline_mode = #tpu.pipeline_mode<synchronous>, transform_indices = @transform_13, window_bounds = array<i64: 8, 2>}, {pipeline_mode = #tpu.pipeline_mode<synchronous>, transform_indices = @transform_14, window_bounds = array<i64: 8, 24>}, {pipeline_mode = #tpu.pipeline_mode<synchronous>, transform_indices = @transform_15, window_bounds = array<i64: 8, 1>}, {transform_indices = @transform_16, window_bounds = array<i64: 2, 8, 16>}]} {
    %cst = arith.constant 0.000000e+00 : f32
    %0 = vector.broadcast %cst : f32 to vector<8x1xf32>
    %c0 = arith.constant 0 : index
    %c0_0 = arith.constant 0 : index
    %c0_1 = arith.constant 0 : index
    %1 = vector.load %arg1[%c0, %c0_0, %c0_1] : memref<2x8x16xf32, #tpu.memory_space<vmem>>, vector<1x8x16xf32>
    %2 = vector.shape_cast %1 : vector<1x8x16xf32> to vector<8x16xf32>
    %c1 = arith.constant 1 : index
    %c0_2 = arith.constant 0 : index
    %c0_3 = arith.constant 0 : index
    %3 = vector.load %arg1[%c1, %c0_2, %c0_3] : memref<2x8x16xf32, #tpu.memory_space<vmem>>, vector<1x8x16xf32>
    %4 = vector.shape_cast %3 : vector<1x8x16xf32> to vector<8x16xf32>
    %5 = tpu.concatenate %0, %2, %0, %0, %4, %0 in 1 : vector<8x1xf32>, vector<8x16xf32>, vector<8x1xf32>, vector<8x1xf32>, vector<8x16xf32>, vector<8x1xf32> -> vector<8x36xf32>
    %cst_4 = arith.constant 0.000000e+00 : f32
    %6 = vector.broadcast %cst_4 : f32 to vector<1x1xf32>
    %cst_5 = arith.constant 1.000000e+00 : f32
    %7 = vector.broadcast %cst_5 : f32 to vector<1x16xf32>
    %cst_6 = arith.constant 0.000000e+00 : f32
    %8 = vector.broadcast %cst_6 : f32 to vector<1x1xf32>
    %9 = tpu.concatenate %6, %7, %8, %6, %7, %8 in 1 : vector<1x1xf32>, vector<1x16xf32>, vector<1x1xf32>, vector<1x1xf32>, vector<1x16xf32>, vector<1x1xf32> -> vector<1x36xf32>
    %c0_7 = arith.constant 0 : index
    %c0_8 = arith.constant 0 : index
    %10 = vector.load %arg5[%c0_7, %c0_8] : memref<32x5xf32, #tpu.memory_space<vmem>>, vector<32x5xf32>
    %11 = vector.extract_strided_slice %10 {offsets = [0, 0], sizes = [32, 1], strides = [1, 1]} : vector<32x5xf32> to vector<32x1xf32>
    %12 = vector.extract_strided_slice %10 {offsets = [0, 1], sizes = [32, 1], strides = [1, 1]} : vector<32x5xf32> to vector<32x1xf32>
    %13 = vector.extract_strided_slice %10 {offsets = [0, 2], sizes = [32, 1], strides = [1, 1]} : vector<32x5xf32> to vector<32x1xf32>
    %14 = vector.extract_strided_slice %10 {offsets = [0, 3], sizes = [32, 1], strides = [1, 1]} : vector<32x5xf32> to vector<32x1xf32>
    %15 = vector.extract_strided_slice %10 {offsets = [0, 4], sizes = [32, 1], strides = [1, 1]} : vector<32x5xf32> to vector<32x1xf32>
    %c0_9 = arith.constant 0 : index
    %c0_10 = arith.constant 0 : index
    %16 = vector.load %arg4[%c0_9, %c0_10] : memref<32x8xf32, #tpu.memory_space<vmem>>, vector<32x8xf32>
    %cst_11 = arith.constant dense<0.000000e+00> : vector<32x36xf32>
    %17 = tpu.matmul %16, %5, %cst_11 {dimension_numbers = #tpu.dot_dimension_numbers<[1], [0], [0], [1], [0, 0, 1, 1], [], []>} : vector<32x8xf32>, vector<8x36xf32>, vector<32x36xf32> -> vector<32x36xf32>
    %18 = vector.broadcast %15 : vector<32x1xf32> to vector<32x36xf32>
    %19 = arith.addf %17, %18 : vector<32x36xf32>
    %cst_12 = arith.constant 0.000000e+00 : f32
    %20 = vector.broadcast %cst_12 : f32 to vector<8x1xf32>
    %21 = vector.extract_strided_slice %5 {offsets = [0, 0], sizes = [8, 35], strides = [1, 1]} : vector<8x36xf32> to vector<8x35xf32>
    %22 = tpu.concatenate %20, %21 in 1 : vector<8x1xf32>, vector<8x35xf32> -> vector<8x36xf32>
    %cst_13 = arith.constant 0.000000e+00 : f32
    %23 = vector.broadcast %cst_13 : f32 to vector<8x1xf32>
    %24 = vector.extract_strided_slice %5 {offsets = [0, 1], sizes = [8, 35], strides = [1, 1]} : vector<8x36xf32> to vector<8x35xf32>
    %25 = tpu.concatenate %24, %23 in 1 : vector<8x35xf32>, vector<8x1xf32> -> vector<8x36xf32>
    %26 = tpu.concatenate %22, %5, %25 in 0 : vector<8x36xf32>, vector<8x36xf32>, vector<8x36xf32> -> vector<24x36xf32>
    %c0_14 = arith.constant 0 : index
    %c0_15 = arith.constant 0 : index
    %27 = vector.load %arg2[%c0_14, %c0_15] : memref<32x24xf32, #tpu.memory_space<vmem>>, vector<32x24xf32>
    %cst_16 = arith.constant dense<0.000000e+00> : vector<32x36xf32>
    %28 = tpu.matmul %27, %26, %cst_16 {dimension_numbers = #tpu.dot_dimension_numbers<[1], [0], [0], [1], [0, 0, 1, 1], [], []>} : vector<32x24xf32>, vector<24x36xf32>, vector<32x36xf32> -> vector<32x36xf32>
    %29 = vector.broadcast %11 : vector<32x1xf32> to vector<32x36xf32>
    %30 = arith.mulf %28, %29 : vector<32x36xf32>
    %31 = vector.broadcast %12 : vector<32x1xf32> to vector<32x36xf32>
    %32 = arith.addf %30, %31 : vector<32x36xf32>
    %cst_17 = arith.constant 0.000000e+00 : f32
    %33 = vector.broadcast %cst_17 : f32 to vector<32x36xf32>
    %34 = arith.cmpf oge, %32, %33 : vector<32x36xf32>
    %cst_18 = arith.constant 1.000000e-01 : f32
    %35 = vector.broadcast %cst_18 : f32 to vector<32x36xf32>
    %36 = arith.mulf %32, %35 : vector<32x36xf32>
    %37 = arith.select %34, %32, %36 : vector<32x36xi1>, vector<32x36xf32>
    %38 = vector.broadcast %9 : vector<1x36xf32> to vector<32x36xf32>
    %39 = arith.mulf %37, %38 : vector<32x36xf32>
    %cst_19 = arith.constant 0.000000e+00 : f32
    %40 = vector.broadcast %cst_19 : f32 to vector<32x1xf32>
    %41 = vector.extract_strided_slice %39 {offsets = [0, 0], sizes = [32, 35], strides = [1, 1]} : vector<32x36xf32> to vector<32x35xf32>
    %42 = tpu.concatenate %40, %41 in 1 : vector<32x1xf32>, vector<32x35xf32> -> vector<32x36xf32>
    %cst_20 = arith.constant 0.000000e+00 : f32
    %43 = vector.broadcast %cst_20 : f32 to vector<32x1xf32>
    %44 = vector.extract_strided_slice %39 {offsets = [0, 1], sizes = [32, 35], strides = [1, 1]} : vector<32x36xf32> to vector<32x35xf32>
    %45 = tpu.concatenate %44, %43 in 1 : vector<32x35xf32>, vector<32x1xf32> -> vector<32x36xf32>
    %46 = tpu.concatenate %42, %39, %45 in 0 : vector<32x36xf32>, vector<32x36xf32>, vector<32x36xf32> -> vector<96x36xf32>
    %c0_21 = arith.constant 0 : index
    %c0_22 = arith.constant 0 : index
    %47 = vector.load %arg3[%c0_21, %c0_22] : memref<32x96xf32, #tpu.memory_space<vmem>>, vector<32x96xf32>
    %cst_23 = arith.constant dense<0.000000e+00> : vector<32x36xf32>
    %48 = tpu.matmul %47, %46, %cst_23 {dimension_numbers = #tpu.dot_dimension_numbers<[1], [0], [0], [1], [0, 0, 1, 1], [], []>} : vector<32x96xf32>, vector<96x36xf32>, vector<32x36xf32> -> vector<32x36xf32>
    %49 = vector.broadcast %13 : vector<32x1xf32> to vector<32x36xf32>
    %50 = arith.mulf %48, %49 : vector<32x36xf32>
    %51 = vector.broadcast %14 : vector<32x1xf32> to vector<32x36xf32>
    %52 = arith.addf %50, %51 : vector<32x36xf32>
    %53 = arith.addf %52, %19 : vector<32x36xf32>
    %cst_24 = arith.constant 0.000000e+00 : f32
    %54 = vector.broadcast %cst_24 : f32 to vector<32x36xf32>
    %55 = arith.cmpf oge, %53, %54 : vector<32x36xf32>
    %cst_25 = arith.constant 1.000000e-01 : f32
    %56 = vector.broadcast %cst_25 : f32 to vector<32x36xf32>
    %57 = arith.mulf %53, %56 : vector<32x36xf32>
    %58 = arith.select %55, %53, %57 : vector<32x36xi1>, vector<32x36xf32>
    %59 = vector.broadcast %9 : vector<1x36xf32> to vector<32x36xf32>
    %60 = arith.mulf %58, %59 : vector<32x36xf32>
    %c0_26 = arith.constant 0 : index
    %c0_27 = arith.constant 0 : index
    %61 = vector.load %arg9[%c0_26, %c0_27] : memref<16x5xf32, #tpu.memory_space<vmem>>, vector<16x5xf32>
    %62 = vector.extract_strided_slice %61 {offsets = [0, 0], sizes = [16, 1], strides = [1, 1]} : vector<16x5xf32> to vector<16x1xf32>
    %63 = vector.extract_strided_slice %61 {offsets = [0, 1], sizes = [16, 1], strides = [1, 1]} : vector<16x5xf32> to vector<16x1xf32>
    %64 = vector.extract_strided_slice %61 {offsets = [0, 2], sizes = [16, 1], strides = [1, 1]} : vector<16x5xf32> to vector<16x1xf32>
    %65 = vector.extract_strided_slice %61 {offsets = [0, 3], sizes = [16, 1], strides = [1, 1]} : vector<16x5xf32> to vector<16x1xf32>
    %66 = vector.extract_strided_slice %61 {offsets = [0, 4], sizes = [16, 1], strides = [1, 1]} : vector<16x5xf32> to vector<16x1xf32>
    %c0_28 = arith.constant 0 : index
    %c0_29 = arith.constant 0 : index
    %67 = vector.load %arg8[%c0_28, %c0_29] : memref<16x32xf32, #tpu.memory_space<vmem>>, vector<16x32xf32>
    %cst_30 = arith.constant dense<0.000000e+00> : vector<16x36xf32>
    %68 = tpu.matmul %67, %60, %cst_30 {dimension_numbers = #tpu.dot_dimension_numbers<[1], [0], [0], [1], [0, 0, 1, 1], [], []>} : vector<16x32xf32>, vector<32x36xf32>, vector<16x36xf32> -> vector<16x36xf32>
    %69 = vector.broadcast %66 : vector<16x1xf32> to vector<16x36xf32>
    %70 = arith.addf %68, %69 : vector<16x36xf32>
    %cst_31 = arith.constant 0.000000e+00 : f32
    %71 = vector.broadcast %cst_31 : f32 to vector<32x1xf32>
    %72 = vector.extract_strided_slice %60 {offsets = [0, 0], sizes = [32, 35], strides = [1, 1]} : vector<32x36xf32> to vector<32x35xf32>
    %73 = tpu.concatenate %71, %72 in 1 : vector<32x1xf32>, vector<32x35xf32> -> vector<32x36xf32>
    %cst_32 = arith.constant 0.000000e+00 : f32
    %74 = vector.broadcast %cst_32 : f32 to vector<32x1xf32>
    %75 = vector.extract_strided_slice %60 {offsets = [0, 1], sizes = [32, 35], strides = [1, 1]} : vector<32x36xf32> to vector<32x35xf32>
    %76 = tpu.concatenate %75, %74 in 1 : vector<32x35xf32>, vector<32x1xf32> -> vector<32x36xf32>
    %77 = tpu.concatenate %73, %60, %76 in 0 : vector<32x36xf32>, vector<32x36xf32>, vector<32x36xf32> -> vector<96x36xf32>
    %c0_33 = arith.constant 0 : index
    %c0_34 = arith.constant 0 : index
    %78 = vector.load %arg6[%c0_33, %c0_34] : memref<16x96xf32, #tpu.memory_space<vmem>>, vector<16x96xf32>
    %cst_35 = arith.constant dense<0.000000e+00> : vector<16x36xf32>
    %79 = tpu.matmul %78, %77, %cst_35 {dimension_numbers = #tpu.dot_dimension_numbers<[1], [0], [0], [1], [0, 0, 1, 1], [], []>} : vector<16x96xf32>, vector<96x36xf32>, vector<16x36xf32> -> vector<16x36xf32>
    %80 = vector.broadcast %62 : vector<16x1xf32> to vector<16x36xf32>
    %81 = arith.mulf %79, %80 : vector<16x36xf32>
    %82 = vector.broadcast %63 : vector<16x1xf32> to vector<16x36xf32>
    %83 = arith.addf %81, %82 : vector<16x36xf32>
    %cst_36 = arith.constant 0.000000e+00 : f32
    %84 = vector.broadcast %cst_36 : f32 to vector<16x36xf32>
    %85 = arith.cmpf oge, %83, %84 : vector<16x36xf32>
    %cst_37 = arith.constant 1.000000e-01 : f32
    %86 = vector.broadcast %cst_37 : f32 to vector<16x36xf32>
    %87 = arith.mulf %83, %86 : vector<16x36xf32>
    %88 = arith.select %85, %83, %87 : vector<16x36xi1>, vector<16x36xf32>
    %89 = vector.broadcast %9 : vector<1x36xf32> to vector<16x36xf32>
    %90 = arith.mulf %88, %89 : vector<16x36xf32>
    %cst_38 = arith.constant 0.000000e+00 : f32
    %91 = vector.broadcast %cst_38 : f32 to vector<16x1xf32>
    %92 = vector.extract_strided_slice %90 {offsets = [0, 0], sizes = [16, 35], strides = [1, 1]} : vector<16x36xf32> to vector<16x35xf32>
    %93 = tpu.concatenate %91, %92 in 1 : vector<16x1xf32>, vector<16x35xf32> -> vector<16x36xf32>
    %cst_39 = arith.constant 0.000000e+00 : f32
    %94 = vector.broadcast %cst_39 : f32 to vector<16x1xf32>
    %95 = vector.extract_strided_slice %90 {offsets = [0, 1], sizes = [16, 35], strides = [1, 1]} : vector<16x36xf32> to vector<16x35xf32>
    %96 = tpu.concatenate %95, %94 in 1 : vector<16x35xf32>, vector<16x1xf32> -> vector<16x36xf32>
    %97 = tpu.concatenate %93, %90, %96 in 0 : vector<16x36xf32>, vector<16x36xf32>, vector<16x36xf32> -> vector<48x36xf32>
    %c0_40 = arith.constant 0 : index
    %c0_41 = arith.constant 0 : index
    %98 = vector.load %arg7[%c0_40, %c0_41] : memref<16x48xf32, #tpu.memory_space<vmem>>, vector<16x48xf32>
    %cst_42 = arith.constant dense<0.000000e+00> : vector<16x36xf32>
    %99 = tpu.matmul %98, %97, %cst_42 {dimension_numbers = #tpu.dot_dimension_numbers<[1], [0], [0], [1], [0, 0, 1, 1], [], []>} : vector<16x48xf32>, vector<48x36xf32>, vector<16x36xf32> -> vector<16x36xf32>
    %100 = vector.broadcast %64 : vector<16x1xf32> to vector<16x36xf32>
    %101 = arith.mulf %99, %100 : vector<16x36xf32>
    %102 = vector.broadcast %65 : vector<16x1xf32> to vector<16x36xf32>
    %103 = arith.addf %101, %102 : vector<16x36xf32>
    %104 = arith.addf %103, %70 : vector<16x36xf32>
    %cst_43 = arith.constant 0.000000e+00 : f32
    %105 = vector.broadcast %cst_43 : f32 to vector<16x36xf32>
    %106 = arith.cmpf oge, %104, %105 : vector<16x36xf32>
    %cst_44 = arith.constant 1.000000e-01 : f32
    %107 = vector.broadcast %cst_44 : f32 to vector<16x36xf32>
    %108 = arith.mulf %104, %107 : vector<16x36xf32>
    %109 = arith.select %106, %104, %108 : vector<16x36xi1>, vector<16x36xf32>
    %110 = vector.broadcast %9 : vector<1x36xf32> to vector<16x36xf32>
    %111 = arith.mulf %109, %110 : vector<16x36xf32>
    %c0_45 = arith.constant 0 : index
    %c0_46 = arith.constant 0 : index
    %112 = vector.load %arg13[%c0_45, %c0_46] : memref<8x5xf32, #tpu.memory_space<vmem>>, vector<8x5xf32>
    %113 = vector.extract_strided_slice %112 {offsets = [0, 0], sizes = [8, 1], strides = [1, 1]} : vector<8x5xf32> to vector<8x1xf32>
    %114 = vector.extract_strided_slice %112 {offsets = [0, 1], sizes = [8, 1], strides = [1, 1]} : vector<8x5xf32> to vector<8x1xf32>
    %115 = vector.extract_strided_slice %112 {offsets = [0, 2], sizes = [8, 1], strides = [1, 1]} : vector<8x5xf32> to vector<8x1xf32>
    %116 = vector.extract_strided_slice %112 {offsets = [0, 3], sizes = [8, 1], strides = [1, 1]} : vector<8x5xf32> to vector<8x1xf32>
    %117 = vector.extract_strided_slice %112 {offsets = [0, 4], sizes = [8, 1], strides = [1, 1]} : vector<8x5xf32> to vector<8x1xf32>
    %c0_47 = arith.constant 0 : index
    %c0_48 = arith.constant 0 : index
    %118 = vector.load %arg12[%c0_47, %c0_48] : memref<8x16xf32, #tpu.memory_space<vmem>>, vector<8x16xf32>
    %cst_49 = arith.constant dense<0.000000e+00> : vector<8x36xf32>
    %119 = tpu.matmul %118, %111, %cst_49 {dimension_numbers = #tpu.dot_dimension_numbers<[1], [0], [0], [1], [0, 0, 1, 1], [], []>} : vector<8x16xf32>, vector<16x36xf32>, vector<8x36xf32> -> vector<8x36xf32>
    %120 = vector.broadcast %117 : vector<8x1xf32> to vector<8x36xf32>
    %121 = arith.addf %119, %120 : vector<8x36xf32>
    %cst_50 = arith.constant 0.000000e+00 : f32
    %122 = vector.broadcast %cst_50 : f32 to vector<16x1xf32>
    %123 = vector.extract_strided_slice %111 {offsets = [0, 0], sizes = [16, 35], strides = [1, 1]} : vector<16x36xf32> to vector<16x35xf32>
    %124 = tpu.concatenate %122, %123 in 1 : vector<16x1xf32>, vector<16x35xf32> -> vector<16x36xf32>
    %cst_51 = arith.constant 0.000000e+00 : f32
    %125 = vector.broadcast %cst_51 : f32 to vector<16x1xf32>
    %126 = vector.extract_strided_slice %111 {offsets = [0, 1], sizes = [16, 35], strides = [1, 1]} : vector<16x36xf32> to vector<16x35xf32>
    %127 = tpu.concatenate %126, %125 in 1 : vector<16x35xf32>, vector<16x1xf32> -> vector<16x36xf32>
    %128 = tpu.concatenate %124, %111, %127 in 0 : vector<16x36xf32>, vector<16x36xf32>, vector<16x36xf32> -> vector<48x36xf32>
    %c0_52 = arith.constant 0 : index
    %c0_53 = arith.constant 0 : index
    %129 = vector.load %arg10[%c0_52, %c0_53] : memref<8x48xf32, #tpu.memory_space<vmem>>, vector<8x48xf32>
    %cst_54 = arith.constant dense<0.000000e+00> : vector<8x36xf32>
    %130 = tpu.matmul %129, %128, %cst_54 {dimension_numbers = #tpu.dot_dimension_numbers<[1], [0], [0], [1], [0, 0, 1, 1], [], []>} : vector<8x48xf32>, vector<48x36xf32>, vector<8x36xf32> -> vector<8x36xf32>
    %131 = vector.broadcast %113 : vector<8x1xf32> to vector<8x36xf32>
    %132 = arith.mulf %130, %131 : vector<8x36xf32>
    %133 = vector.broadcast %114 : vector<8x1xf32> to vector<8x36xf32>
    %134 = arith.addf %132, %133 : vector<8x36xf32>
    %cst_55 = arith.constant 0.000000e+00 : f32
    %135 = vector.broadcast %cst_55 : f32 to vector<8x36xf32>
    %136 = arith.cmpf oge, %134, %135 : vector<8x36xf32>
    %cst_56 = arith.constant 1.000000e-01 : f32
    %137 = vector.broadcast %cst_56 : f32 to vector<8x36xf32>
    %138 = arith.mulf %134, %137 : vector<8x36xf32>
    %139 = arith.select %136, %134, %138 : vector<8x36xi1>, vector<8x36xf32>
    %140 = vector.broadcast %9 : vector<1x36xf32> to vector<8x36xf32>
    %141 = arith.mulf %139, %140 : vector<8x36xf32>
    %cst_57 = arith.constant 0.000000e+00 : f32
    %142 = vector.broadcast %cst_57 : f32 to vector<8x1xf32>
    %143 = vector.extract_strided_slice %141 {offsets = [0, 0], sizes = [8, 35], strides = [1, 1]} : vector<8x36xf32> to vector<8x35xf32>
    %144 = tpu.concatenate %142, %143 in 1 : vector<8x1xf32>, vector<8x35xf32> -> vector<8x36xf32>
    %cst_58 = arith.constant 0.000000e+00 : f32
    %145 = vector.broadcast %cst_58 : f32 to vector<8x1xf32>
    %146 = vector.extract_strided_slice %141 {offsets = [0, 1], sizes = [8, 35], strides = [1, 1]} : vector<8x36xf32> to vector<8x35xf32>
    %147 = tpu.concatenate %146, %145 in 1 : vector<8x35xf32>, vector<8x1xf32> -> vector<8x36xf32>
    %148 = tpu.concatenate %144, %141, %147 in 0 : vector<8x36xf32>, vector<8x36xf32>, vector<8x36xf32> -> vector<24x36xf32>
    %c0_59 = arith.constant 0 : index
    %c0_60 = arith.constant 0 : index
    %149 = vector.load %arg11[%c0_59, %c0_60] : memref<8x24xf32, #tpu.memory_space<vmem>>, vector<8x24xf32>
    %cst_61 = arith.constant dense<0.000000e+00> : vector<8x36xf32>
    %150 = tpu.matmul %149, %148, %cst_61 {dimension_numbers = #tpu.dot_dimension_numbers<[1], [0], [0], [1], [0, 0, 1, 1], [], []>} : vector<8x24xf32>, vector<24x36xf32>, vector<8x36xf32> -> vector<8x36xf32>
    %151 = vector.broadcast %115 : vector<8x1xf32> to vector<8x36xf32>
    %152 = arith.mulf %150, %151 : vector<8x36xf32>
    %153 = vector.broadcast %116 : vector<8x1xf32> to vector<8x36xf32>
    %154 = arith.addf %152, %153 : vector<8x36xf32>
    %155 = arith.addf %154, %121 : vector<8x36xf32>
    %cst_62 = arith.constant 0.000000e+00 : f32
    %156 = vector.broadcast %cst_62 : f32 to vector<8x36xf32>
    %157 = arith.cmpf oge, %155, %156 : vector<8x36xf32>
    %cst_63 = arith.constant 1.000000e-01 : f32
    %158 = vector.broadcast %cst_63 : f32 to vector<8x36xf32>
    %159 = arith.mulf %155, %158 : vector<8x36xf32>
    %160 = arith.select %157, %155, %159 : vector<8x36xi1>, vector<8x36xf32>
    %161 = vector.broadcast %9 : vector<1x36xf32> to vector<8x36xf32>
    %162 = arith.mulf %160, %161 : vector<8x36xf32>
    %c0_64 = arith.constant 0 : index
    %c0_65 = arith.constant 0 : index
    %163 = vector.load %arg14[%c0_64, %c0_65] : memref<8x2xf32, #tpu.memory_space<vmem>>, vector<8x2xf32>
    %164 = vector.extract_strided_slice %163 {offsets = [0, 0], sizes = [8, 1], strides = [1, 1]} : vector<8x2xf32> to vector<8x1xf32>
    %165 = vector.broadcast %164 : vector<8x1xf32> to vector<8x36xf32>
    %166 = arith.mulf %162, %165 : vector<8x36xf32>
    %167 = vector.extract_strided_slice %163 {offsets = [0, 1], sizes = [8, 1], strides = [1, 1]} : vector<8x2xf32> to vector<8x1xf32>
    %168 = vector.broadcast %167 : vector<8x1xf32> to vector<8x36xf32>
    %169 = arith.addf %166, %168 : vector<8x36xf32>
    %170 = vector.broadcast %9 : vector<1x36xf32> to vector<8x36xf32>
    %171 = arith.mulf %169, %170 : vector<8x36xf32>
    %c0_66 = arith.constant 0 : index
    %c0_67 = arith.constant 0 : index
    %172 = vector.load %arg16[%c0_66, %c0_67] : memref<8x1xf32, #tpu.memory_space<vmem>>, vector<8x1xf32>
    %cst_68 = arith.constant 0.000000e+00 : f32
    %173 = vector.broadcast %cst_68 : f32 to vector<8x1xf32>
    %174 = vector.extract_strided_slice %171 {offsets = [0, 0], sizes = [8, 35], strides = [1, 1]} : vector<8x36xf32> to vector<8x35xf32>
    %175 = tpu.concatenate %173, %174 in 1 : vector<8x1xf32>, vector<8x35xf32> -> vector<8x36xf32>
    %cst_69 = arith.constant 0.000000e+00 : f32
    %176 = vector.broadcast %cst_69 : f32 to vector<8x1xf32>
    %177 = vector.extract_strided_slice %171 {offsets = [0, 1], sizes = [8, 35], strides = [1, 1]} : vector<8x36xf32> to vector<8x35xf32>
    %178 = tpu.concatenate %177, %176 in 1 : vector<8x35xf32>, vector<8x1xf32> -> vector<8x36xf32>
    %179 = tpu.concatenate %175, %171, %178 in 0 : vector<8x36xf32>, vector<8x36xf32>, vector<8x36xf32> -> vector<24x36xf32>
    %c0_70 = arith.constant 0 : index
    %c0_71 = arith.constant 0 : index
    %180 = vector.load %arg15[%c0_70, %c0_71] : memref<8x24xf32, #tpu.memory_space<vmem>>, vector<8x24xf32>
    %cst_72 = arith.constant dense<0.000000e+00> : vector<8x36xf32>
    %181 = tpu.matmul %180, %179, %cst_72 {dimension_numbers = #tpu.dot_dimension_numbers<[1], [0], [0], [1], [0, 0, 1, 1], [], []>} : vector<8x24xf32>, vector<24x36xf32>, vector<8x36xf32> -> vector<8x36xf32>
    %182 = vector.broadcast %172 : vector<8x1xf32> to vector<8x36xf32>
    %183 = arith.addf %181, %182 : vector<8x36xf32>
    %cst_73 = arith.constant 0.000000e+00 : f32
    %184 = vector.broadcast %cst_73 : f32 to vector<8x36xf32>
    %185 = arith.cmpf oge, %183, %184 : vector<8x36xf32>
    %cst_74 = arith.constant 1.000000e-01 : f32
    %186 = vector.broadcast %cst_74 : f32 to vector<8x36xf32>
    %187 = arith.mulf %183, %186 : vector<8x36xf32>
    %188 = arith.select %185, %183, %187 : vector<8x36xi1>, vector<8x36xf32>
    %189 = vector.extract_strided_slice %188 {offsets = [0, 1], sizes = [8, 16], strides = [1, 1]} : vector<8x36xf32> to vector<8x16xf32>
    %c0_75 = arith.constant 0 : index
    %c0_76 = arith.constant 0 : index
    %c0_77 = arith.constant 0 : index
    %190 = vector.load %arg17[%c0_75, %c0_76, %c0_77] : memref<2x8x16xf32, #tpu.memory_space<vmem>>, vector<1x8x16xf32>
    %191 = vector.shape_cast %190 : vector<1x8x16xf32> to vector<8x16xf32>
    %192 = vector.shape_cast %189 : vector<8x16xf32> to vector<1x8x16xf32>
    tpu.vector_store %arg17[%c0_75, %c0_76, %c0_77], %192 {strides = array<i32>} : memref<2x8x16xf32, #tpu.memory_space<vmem>>, vector<1x8x16xf32>,
    %193 = vector.extract_strided_slice %188 {offsets = [0, 19], sizes = [8, 16], strides = [1, 1]} : vector<8x36xf32> to vector<8x16xf32>
    %c1_78 = arith.constant 1 : index
    %c0_79 = arith.constant 0 : index
    %c0_80 = arith.constant 0 : index
    %194 = vector.load %arg17[%c1_78, %c0_79, %c0_80] : memref<2x8x16xf32, #tpu.memory_space<vmem>>, vector<1x8x16xf32>
    %195 = vector.shape_cast %194 : vector<1x8x16xf32> to vector<8x16xf32>
    %196 = vector.shape_cast %193 : vector<8x16xf32> to vector<1x8x16xf32>
    tpu.vector_store %arg17[%c1_78, %c0_79, %c0_80], %196 {strides = array<i32>} : memref<2x8x16xf32, #tpu.memory_space<vmem>>, vector<1x8x16xf32>,
    return
  }
  func.func @transform_0(%arg0: i32) -> (i32, i32, i32) {
    %c0_i32 = arith.constant 0 : i32
    %c0_i32_0 = arith.constant 0 : i32
    %c0_i32_1 = arith.constant 0 : i32
    return %arg0, %c0_i32, %c0_i32_0 : i32, i32, i32
  }
  func.func @transform_1(%arg0: i32) -> (i32, i32) {
    %c0_i32 = arith.constant 0 : i32
    %c0_i32_0 = arith.constant 0 : i32
    %c0_i32_1 = arith.constant 0 : i32
    return %c0_i32, %c0_i32_0 : i32, i32
  }
  func.func @transform_2(%arg0: i32) -> (i32, i32) {
    %c0_i32 = arith.constant 0 : i32
    %c0_i32_0 = arith.constant 0 : i32
    %c0_i32_1 = arith.constant 0 : i32
    return %c0_i32, %c0_i32_0 : i32, i32
  }
  func.func @transform_3(%arg0: i32) -> (i32, i32) {
    %c0_i32 = arith.constant 0 : i32
    %c0_i32_0 = arith.constant 0 : i32
    %c0_i32_1 = arith.constant 0 : i32
    return %c0_i32, %c0_i32_0 : i32, i32
  }
  func.func @transform_4(%arg0: i32) -> (i32, i32) {
    %c0_i32 = arith.constant 0 : i32
    %c0_i32_0 = arith.constant 0 : i32
    %c0_i32_1 = arith.constant 0 : i32
    return %c0_i32, %c0_i32_0 : i32, i32
  }
  func.func @transform_5(%arg0: i32) -> (i32, i32) {
    %c0_i32 = arith.constant 0 : i32
    %c0_i32_0 = arith.constant 0 : i32
    %c0_i32_1 = arith.constant 0 : i32
    return %c0_i32, %c0_i32_0 : i32, i32
  }
  func.func @transform_6(%arg0: i32) -> (i32, i32) {
    %c0_i32 = arith.constant 0 : i32
    %c0_i32_0 = arith.constant 0 : i32
    %c0_i32_1 = arith.constant 0 : i32
    return %c0_i32, %c0_i32_0 : i32, i32
  }
  func.func @transform_7(%arg0: i32) -> (i32, i32) {
    %c0_i32 = arith.constant 0 : i32
    %c0_i32_0 = arith.constant 0 : i32
    %c0_i32_1 = arith.constant 0 : i32
    return %c0_i32, %c0_i32_0 : i32, i32
  }
  func.func @transform_8(%arg0: i32) -> (i32, i32) {
    %c0_i32 = arith.constant 0 : i32
    %c0_i32_0 = arith.constant 0 : i32
    %c0_i32_1 = arith.constant 0 : i32
    return %c0_i32, %c0_i32_0 : i32, i32
  }
  func.func @transform_9(%arg0: i32) -> (i32, i32) {
    %c0_i32 = arith.constant 0 : i32
    %c0_i32_0 = arith.constant 0 : i32
    %c0_i32_1 = arith.constant 0 : i32
    return %c0_i32, %c0_i32_0 : i32, i32
  }
  func.func @transform_10(%arg0: i32) -> (i32, i32) {
    %c0_i32 = arith.constant 0 : i32
    %c0_i32_0 = arith.constant 0 : i32
    %c0_i32_1 = arith.constant 0 : i32
    return %c0_i32, %c0_i32_0 : i32, i32
  }
  func.func @transform_11(%arg0: i32) -> (i32, i32) {
    %c0_i32 = arith.constant 0 : i32
    %c0_i32_0 = arith.constant 0 : i32
    %c0_i32_1 = arith.constant 0 : i32
    return %c0_i32, %c0_i32_0 : i32, i32
  }
  func.func @transform_12(%arg0: i32) -> (i32, i32) {
    %c0_i32 = arith.constant 0 : i32
    %c0_i32_0 = arith.constant 0 : i32
    %c0_i32_1 = arith.constant 0 : i32
    return %c0_i32, %c0_i32_0 : i32, i32
  }
  func.func @transform_13(%arg0: i32) -> (i32, i32) {
    %c0_i32 = arith.constant 0 : i32
    %c0_i32_0 = arith.constant 0 : i32
    %c0_i32_1 = arith.constant 0 : i32
    return %c0_i32, %c0_i32_0 : i32, i32
  }
  func.func @transform_14(%arg0: i32) -> (i32, i32) {
    %c0_i32 = arith.constant 0 : i32
    %c0_i32_0 = arith.constant 0 : i32
    %c0_i32_1 = arith.constant 0 : i32
    return %c0_i32, %c0_i32_0 : i32, i32
  }
  func.func @transform_15(%arg0: i32) -> (i32, i32) {
    %c0_i32 = arith.constant 0 : i32
    %c0_i32_0 = arith.constant 0 : i32
    %c0_i32_1 = arith.constant 0 : i32
    return %c0_i32, %c0_i32_0 : i32, i32
  }
  func.func @transform_16(%arg0: i32) -> (i32, i32, i32) {
    %c0_i32 = arith.constant 0 : i32
    %c0_i32_0 = arith.constant 0 : i32
    %c0_i32_1 = arith.constant 0 : i32
    return %arg0, %c0_i32, %c0_i32_0 : i32, i32, i32
  }
}

</mosaic_0001>

<bundles_post_ra>
// kernel: upscale_net_x1.1
= control target key start
LH: loop header
LB: loop body
LE: loop exit
PB: predicated region body
PF: predicated region fallthrough
CT: control target
= control target key end

     0   :  { %s2361_s0 = inlined_call_operand.vmem [shape: f32[2,8,16], index: 0, kind: input, shape index: {}]   ;;  %s2362_s1 = inlined_call_operand.vmem [shape: f32[32,24], index: 1, kind: input, shape index: {}]   ;;  %s2363_s2 = inlined_call_operand.vmem [shape: f32[32,96], index: 2, kind: input, shape index: {}]   ;;  %s2364_s3 = inlined_call_operand.vmem [shape: f32[32,8], index: 3, kind: input, shape index: {}]   ;;  %s2365_s4 = inlined_call_operand.vmem [shape: f32[32,5], index: 4, kind: input, shape index: {}]   ;;  %s2366_s5 = inlined_call_operand.vmem [shape: f32[16,96], index: 5, kind: input, shape index: {}]   ;;  %s2367_s6 = inlined_call_operand.vmem [shape: f32[16,48], index: 6, kind: input, shape index: {}]   ;;  %s2368_s7 = inlined_call_operand.vmem [shape: f32[16,32], index: 7, kind: input, shape index: {}]   ;;  %s2369_s8 = inlined_call_operand.vmem [shape: f32[16,5], index: 8, kind: input, shape index: {}]   ;;  %s2370_s9 = inlined_call_operand.vmem [shape: f32[8,48], index: 9, kind: input, shape index: {}]   ;;  %s2371_s10 = inlined_call_operand.vmem [shape: f32[8,24], index: 10, kind: input, shape index: {}]   ;;  %s2372_s11 = inlined_call_operand.vmem [shape: f32[8,16], index: 11, kind: input, shape index: {}]   ;;  %s2373_s12 = inlined_call_operand.vmem [shape: f32[8,5], index: 12, kind: input, shape index: {}]   ;;  %s2374_s13 = inlined_call_operand.vmem [shape: f32[8,2], index: 13, kind: input, shape index: {}]   ;;  %s2375_s14 = inlined_call_operand.vmem [shape: f32[8,24], index: 14, kind: input, shape index: {}]   ;;  %s2376_s15 = inlined_call_operand.vmem [shape: f32[8,1], index: 15, kind: input, shape index: {}]   ;;  %s2377_s16 = inlined_call_operand.hbm [shape: f32[2,8,16], index: 16, kind: output, shape index: {}]  }
   0x1   :  { %2379 = sst [smem:[#allocation5_spill]] %s2361_s0 }
   0x2   :  { %s2380_s23 = sld [smem:[#allocation5_spill]]  ;;  %s1901_s24 = smov 1  }
   0x8   :  { %v54_v0 = vld [vmem:[%s2380_s23] sm:$0xff]  ;;  %v1366_v1 = vld [vmem:[%s2380_s23 + $0x8] sm:$0xff] }
   0x9   :  { %58 = vrot.lane.b32.xlu0 %v54_v0, %s1901_s24 }
   0xa   :  { %21 = vsyncpa [#allocation3], 0  ;;  %s1902_s27 = smov 19   ;;  %vm65_vm0 = vcmask 7168   ;;  %vm67_vm1 = vcmask 138240   ;;  %vm69_vm2 = vcmask 146432   ;;  %v369_v28 = vlaneseq }
   0xb   :  { %v215_v3 = vld [vmem:[%s2362_s1] sm:$0xff]  ;;  %vm219_vm3 = vcmask 195584   ;;  %vm71_vm4 = vcmask 154624   ;;  %vm73_vm5 = vcmask 285696   ;;  %v1903_v10 = vmov 0   ;;  %s1904_s17 = smov 127   ;;  %vm2058_vm6 = vmneg %vm65_vm0 }
   0xc   :  { %1524 = vmatprep.mubr.msk.f32.mxu1 %vm219_vm3, %v215_v3  ;;  %1787 = vset.pattern.permute.xlu1 %v1903_v10  ;;  %v2026_v11 = vld [vmem:[%s2365_s4] sm:$0xff]  ;;  %v2034_v12 = vld [vmem:[%s2365_s4 + $0x8] sm:$0xff]  ;;  %v1905_v13 = vmov 1   ;;  %v2042_v14 = vld [vmem:[%s2365_s4 + $0x10] sm:$0xff]  ;;  %v1906_v25 = vmov 1.0   ;;  %v370_v32 = vshrl.u32 %v369_v28, 7 }
   0xd   :  { %62 = vrot.lane.b32.xlu0 %v1366_v1, %s1902_s27  ;;  %v2052_v15 = vld [vmem:[%s2365_s4 + $0x18] sm:$0xff]  ;;  %vm1654_vm7 = vmpackc.low %vm73_vm5, %vm2058_vm6  ;;  %v216_v20 = vld [vmem:[%s2362_s1 + $0x8] sm:$0xff]  ;;  %v75_v26 = vsel %vm65_vm0, 0.0, %v1906_v25  ;;  %vm108_vm8 = vcmask 64512   ;;  %vm417_vm13 = vcmask 785408  }
   0xe   :  { %1786 = vset.pattern.permute.xlu0 %v1903_v10  ;;  %v217_v21 = vld [vmem:[%s2362_s1 + $0x10] sm:$0xff]  ;;  %v218_v22 = vld [vmem:[%s2362_s1 + $0x18] sm:$0xff]  ;;  %v76_v27 = vsel %vm67_vm1, %v75_v26, 0.0  ;;  %v371_v34 = vsub.s32 0, %v370_v32  ;;  %v84_v42 = vld [vmem:[%s2364_s3] sm:$0xff] }
   0xf   :  { %v77_v30 = vsel %vm69_vm2, %v76_v27, 0.0  ;;  %1512 = vmatprep.mubr.msk.f32.mxu0 %vm108_vm8, %v84_v42  ;;  %v85_v44 = vld [vmem:[%s2364_s3 + $0x8] sm:$0xff]  ;;  %vm2139_vm14 = vmpackc.low %vm2058_vm6, %vm2058_vm6 }
  0x10   :  { %v78_v33 = vsel %vm71_vm4, %v77_v30, 1.0  ;;  %vm2153_vm15 = vmpackc.low %vm73_vm5, %vm73_vm5 }
  0x11   :  { %318 = vperm.xlu0 %1786, %v2026_v11   ;;  %v79_v37 = vsel %vm73_vm5, %v78_v33, 0.0 }
  0x12   :  { %v2091_v45 = vrot.slane %v79_v37, %v371_v34  ;;  %v414_v34 = vld [vmem:[%s2363_s2 + $0x8] sm:$0xff] }
  0x15   :  { %1789 = vset.pattern.permute.xlu0 %v1905_v13 }
  0x16   :  { %342 = vperm.xlu0 %1789, %v2034_v12  }
  0x1a   :  { %346 = vperm.xlu0 %1789, %v2042_v14  }
  0x7b   :  { %v59_v2 = vpop.permute.xlu0 %58 }
  0x7c   :  { %v66_v4 = vsel %vm65_vm0, 0.0, %v59_v2  ;;  %vm589_vm0 = vcmask 261120  }
  0x7d   :  { %v68_v5 = vsel %vm67_vm1, %v66_v4, 0.0 }
  0x7e   :  { %v70_v6 = vsel %vm69_vm2, %v68_v5, 0.0 }
  0x7f   :  { %v63_v7 = vpop.permute.xlu0 %62 }
  0x80   :  { %v72_v8 = vsel %vm71_vm4, %v70_v6, %v63_v7  ;;  %v86_v7 = vld [vmem:[%s2364_s3 + $0x10] sm:$0xff] }
  0x81   :  { %1510 = vmatprep.subr.msk.mxu0 %vm73_vm5, %v72_v8  ;;  %v74_v9 = vsel %vm73_vm5, %v72_v8, 0.0 }
  0x82   :  { %1511 = vmatpush3.msk.msra.mxu0 %vm73_vm5, %v72_v8  ;;  %207 = vrot.lane.b32.xlu1 %v74_v9, %s1901_s24 }
  0x83   :  { %1513 = vmatmul.mubr.msk.f32.vlgmr.msra.gmra.mrb[0].mxu0 %vm108_vm8, %v85_v44 }
  0x84   :  { %1515 = vmatprep.mubr.msk.f32.mxu0 %vm108_vm8, %v86_v7 }
  0x86   :  { %211 = vrot.lane.b32.xlu1 %v74_v9, %s1904_s17  ;;  %v413_v9 = vld [vmem:[%s2363_s2] sm:$0xff] }
  0x8a   :  { %322 = vperm.xlu1 %1787, %v2034_v12  }
  0x8e   :  { %1788 = vset.pattern.permute.xlu1 %v1905_v13 }
  0x8f   :  { %338 = vperm.xlu1 %1788, %v2026_v11  }
  0x90   :  { %v319_v31 = vpop.permute.xlu0 %318 }
  0x93   :  { %1790 = vset.pattern.permute.xlu1 %v1903_v10 }
  0x94   :  { %326 = vperm.xlu1 %1790, %v2042_v14  }
  0x95   :  { %v343_v38 = vpop.permute.xlu0 %342 }
  0x98   :  { %330 = vperm.xlu1 %1790, %v2052_v15  }
  0x99   :  { %v347_v55 = vpop.permute.xlu0 %346 }
  0x9c   :  { %1791 = vset.pattern.permute.xlu1 %v1905_v13 }
  0x9d   :  { %350 = vperm.xlu1 %1791, %v2052_v15  }
  0xf4   :  { %v208_v17 = vpop.permute.xlu1 %207 }
  0xf5   :  { %v1653_v18 = vpack.c.bf16 %v72_v8, %v208_v17  ;;  %v87_v8 = vld [vmem:[%s2364_s3 + $0x18] sm:$0xff]  ;;  %v1907_v17 = vmov 2  }
  0xf6   :  { %1516 = vmatmul.mubr.msk.f32.gmra.mrb[2].mxu0 %vm108_vm8, %v87_v8  ;;  %1812 = vset.pattern.permute.xlu0 %v1907_v17 }
  0xf7   :  { %1655 = vmatprep.subr.msk.bf16.mxu1 %vm1654_vm7, %v1653_v18  ;;  %1554 = vmatprep.mubr.msk.f32.mxu0 %vm417_vm13, %v413_v9 }
  0xf8   :  { %1658 = vmatpush3.bf16.msk.msra.mxu1 %vm1654_vm7, %v1653_v18  ;;  %v212_v19 = vpop.permute.xlu1 %211  ;;  %1813 = vset.pattern.permute.xlu1 %v1907_v17  ;;  %v1908_v18 = vmov 4  }
  0xf9   :  { %1522 = vmatprep.subr.msk.mxu1 %vm73_vm5, %v212_v19 }
  0xfc   :  { %1523 = vmatpush3.msk.msra.mxu1 %vm73_vm5, %v212_v19  ;;  %v1909_v19 = vmov 3  }
  0xfd   :  { %1525 = vmatmul.mubr.msk.f32.vlgmr.msra.gmra.mrb[0].mxu1 %vm219_vm3, %v216_v20 }
  0xfe   :  { %1527 = vmatprep.mubr.msk.f32.mxu1 %vm219_vm3, %v217_v21 }
 0x101   :  { %1528 = vmatmul.mubr.msk.f32.gmra.mrb[2].mxu1 %vm219_vm3, %v218_v22 }
 0x109   :  { %v323_v23 = vpop.permute.xlu1 %322 }
 0x10e   :  { %v339_v24 = vpop.permute.xlu1 %338 }
 0x113   :  { %v327_v29 = vpop.permute.xlu1 %326 }
 0x117   :  { %v331_v35 = vpop.permute.xlu1 %330 }
 0x11c   :  { %v351_v48 = vpop.permute.xlu1 %350 }
 0x156   :  { %v1514_v37 = vpop.f32.mrb[0].mxu0 }
 0x1d0   :  { %v1526_v36 = vpop.f32.mrb[0].mxu1 }
 0x1d1   :  { %v334_v39 = vmul.f32 %v1526_v36, %v323_v23  ;;  %v298_v40 = vpop.f32.mrb[1].mxu1  ;;  %v416_v36 = vld [vmem:[%s2363_s2 + $0x18] sm:$0xff] }
 0x1d2   :  { %v333_v41 = vmul.f32 %v319_v31, %v298_v40 }
 0x1d3   :  { %v354_v43 = vadd.f32 %v343_v38, %v334_v39  ;;  %v187_v38 = vpop.f32.mrb[1].mxu0 }
 0x1d4   :  { %v353_v46 = vadd.f32 %v339_v24, %v333_v41  ;;  %v1529_v47 = vpop.f32.mrb[2].mxu1  ;;  %v1517_v39 = vpop.f32.mrb[2].mxu0 }
 0x1d5   :  { %vm358_vm9 = vcmp.ge.f32.partialorder %v354_v43, 0.0  ;;  %v362_v49 = vmul.f32 0.1, %v354_v43  ;;  %v336_v50 = vmul.f32 %v1529_v47, %v331_v35  ;;  %v308_v51 = vpop.f32.mrb[3].mxu1  ;;  %v415_v35 = vld [vmem:[%s2363_s2 + $0x10] sm:$0xff]  ;;  %v197_v40 = vpop.f32.mrb[3].mxu0 }
 0x1d6   :  { %vm357_vm10 = vcmp.ge.f32.partialorder %v353_v46, 0.0  ;;  %v361_v52 = vmul.f32 0.1, %v353_v46  ;;  %v335_v53 = vmul.f32 %v327_v29, %v308_v51 }
 0x1d7   :  { %v366_v54 = vsel %vm358_vm9, %v354_v43, %v362_v49  ;;  %v356_v56 = vadd.f32 %v351_v48, %v336_v50 }
 0x1d8   :  { %v374_v57 = vmul.f32 %v2091_v45, %v366_v54  ;;  %v365_v58 = vsel %vm357_vm10, %v353_v46, %v361_v52  ;;  %v355_v59 = vadd.f32 %v347_v55, %v335_v53  ;;  %vm838_vm10 = vcmask 392192  }
 0x1d9   :  { %v373_v60 = vmul.f32 %v2091_v45, %v365_v58  ;;  %vm360_vm11 = vcmp.ge.f32.partialorder %v356_v56, 0.0  ;;  %v364_v61 = vmul.f32 0.1, %v356_v56 }
 0x1da   :  { %vm359_vm12 = vcmp.ge.f32.partialorder %v355_v59, 0.0  ;;  %v363_v62 = vmul.f32 0.1, %v355_v59 }
 0x1db   :  { %v368_v63 = vsel %vm360_vm11, %v356_v56, %v364_v61  ;;  %v1792_v0 = vpack.i.bf16 %v374_v57, %v373_v60  ;;  %v1671_v1 = vpack.c.bf16 %v374_v57, %v373_v60 }
 0x1dc   :  { %v367_v2 = vsel %vm359_vm12, %v355_v59, %v363_v62  ;;  %v376_v3 = vmul.f32 %v2091_v45, %v368_v63  ;;  %v577_v62 = vld [vmem:[%s2368_s7] sm:$0xff] }
 0x1dd   :  { %v375_v4 = vmul.f32 %v2091_v45, %v367_v2  ;;  %1793 = vrot.lane.b32.xlu0 %v1792_v0, %s1901_s24  ;;  %1568 = vmatprep.mubr.msk.f32.mxu1 %vm589_vm0, %v577_v62 }
 0x1df   :  { %v1797_v5 = vpack.i.bf16 %v376_v3, %v375_v4  ;;  %v1675_v6 = vpack.c.bf16 %v376_v3, %v375_v4 }
 0x1e1   :  { %1803 = vrot.lane.b32.xlu0 %v1792_v0, %s1904_s17  ;;  %1798 = vrot.lane.b32.xlu1 %v1797_v5, %s1901_s24 }
 0x1e5   :  { %1808 = vrot.lane.b32.xlu1 %v1797_v5, %s1904_s17  ;;  %516 = vperm.xlu0 %1812, %v2026_v11  }
 0x1e9   :  { %520 = vperm.xlu1 %1813, %v2034_v12   ;;  %524 = vperm.xlu0 %1812, %v2042_v14  }
 0x1ed   :  { %1814 = vset.pattern.permute.xlu1 %v1908_v18  ;;  %1816 = vset.pattern.permute.xlu0 %v1908_v18 }
 0x1ee   :  { %90 = vperm.xlu1 %1814, %v2026_v11   ;;  %95 = vperm.xlu0 %1816, %v2034_v12  }
 0x1f2   :  { %1815 = vset.pattern.permute.xlu1 %v1909_v19  ;;  %105 = vperm.xlu0 %1816, %v2052_v15  }
 0x1f3   :  { %536 = vperm.xlu1 %1815, %v2026_v11  }
 0x1f6   :  { %1840 = vset.pattern.permute.xlu0 %v1903_v10 }
 0x1f7   :  { %540 = vperm.xlu1 %1815, %v2034_v12  }
 0x1fb   :  { %1817 = vset.pattern.permute.xlu1 %v1907_v17 }
 0x1fc   :  { %528 = vperm.xlu1 %1817, %v2052_v15  }
 0x200   :  { %1818 = vset.pattern.permute.xlu1 %v1908_v18 }
 0x201   :  { %100 = vperm.xlu1 %1818, %v2042_v14  }
 0x205   :  { %1819 = vset.pattern.permute.xlu1 %v1909_v19 }
 0x206   :  { %544 = vperm.xlu1 %1819, %v2042_v14  }
 0x20a   :  { %548 = vperm.xlu1 %1819, %v2052_v15  }
 0x20e   :  { %1841 = vset.pattern.permute.xlu1 %v1903_v10 }
 0x24f   :  { %v1794_v11 = vpop.permute.xlu0 %1793 }
 0x250   :  { %v1796_v12 = vunpack.i.h.bf16 %v1794_v11  ;;  %v1795_v20 = vunpack.i.l.bf16 %v1794_v11 }
 0x252   :  { %v1659_v22 = vpack.c.bf16 %v1796_v12, %v1795_v20 }
 0x253   :  { %v1799_v23 = vpop.permute.xlu1 %1798  ;;  %v1804_v15 = vpop.permute.xlu0 %1803 }
 0x254   :  { %v1801_v24 = vunpack.i.h.bf16 %v1799_v23  ;;  %v1800_v25 = vunpack.i.l.bf16 %v1799_v23  ;;  %1661 = vmatprep.subr.msk.bf16.mxu0 %vm2139_vm14, %v1659_v22  ;;  %v1806_v26 = vunpack.i.h.bf16 %v1804_v15  ;;  %v1805_v27 = vunpack.i.l.bf16 %v1804_v15 }
 0x255   :  { %1664 = vmatpush3.bf16.msk.msra.mxu0 %vm2139_vm14, %v1659_v22 }
 0x256   :  { %v1665_v14 = vpack.c.bf16 %v1801_v24, %v1800_v25  ;;  %v1679_v30 = vpack.c.bf16 %v1806_v26, %v1805_v27 }
 0x257   :  { %v1809_v28 = vpop.permute.xlu1 %1808 }
 0x258   :  { %1667 = vmatprep.subr.msk.bf16.mxu0 %vm2139_vm14, %v1665_v14  ;;  %v1811_v31 = vunpack.i.h.bf16 %v1809_v28  ;;  %v1810_v32 = vunpack.i.l.bf16 %v1809_v28 }
 0x259   :  { %1670 = vmatpush3.bf16.msk.msra.mxu0 %vm2139_vm14, %v1665_v14 }
 0x25a   :  { %1672 = vmatprep.subr.bf16.mxu0 %v1671_v1  ;;  %v1685_v33 = vpack.c.bf16 %v1811_v31, %v1810_v32 }
 0x25d   :  { %1674 = vmatpush3.bf16.msra.mxu0 %v1671_v1 }
 0x25e   :  { %1676 = vmatprep.subr.bf16.mxu0 %v1675_v6 }
 0x261   :  { %1678 = vmatpush3.bf16.msra.mxu0 %v1675_v6 }
 0x262   :  { %1681 = vmatprep.subr.msk.bf16.mxu0 %vm2153_vm15, %v1679_v30 }
 0x264   :  { %v517_v46 = vpop.permute.xlu0 %516 }
 0x265   :  { %1684 = vmatpush3.bf16.msk.msra.mxu0 %vm2153_vm15, %v1679_v30 }
 0x266   :  { %1687 = vmatprep.subr.msk.bf16.mxu0 %vm2153_vm15, %v1685_v33 }
 0x268   :  { %v521_v41 = vpop.permute.xlu1 %520  ;;  %v525_v48 = vpop.permute.xlu0 %524 }
 0x269   :  { %1690 = vmatpush3.bf16.msk.msra.mxu0 %vm2153_vm15, %v1685_v33 }
 0x26c   :  { %1555 = vmatmul.mubr.msk.f32.vlgmr.msra.gmra.mrb[4].mxu0 %vm417_vm13, %v414_v34 }
 0x26d   :  { %1557 = vmatprep.mubr.msk.f32.mxu0 %vm417_vm13, %v415_v35  ;;  %v91_v42 = vpop.permute.xlu1 %90  ;;  %v96_v50 = vpop.permute.xlu0 %95  ;;  %v578_v35 = vld [vmem:[%s2368_s7 + $0x8] sm:$0xff] }
 0x26e   :  { %v193_v56 = vadd.f32 %v1514_v37, %v96_v50  ;;  %v188_v58 = vadd.f32 %v187_v38, %v91_v42  ;;  %v2200_v37 = vld [vmem:[%s2369_s8] sm:$0xff]  ;;  %v2205_v38 = vld [vmem:[%s2369_s8 + $0x8] sm:$0xff] }
 0x270   :  { %1558 = vmatmul.mubr.msk.f32.gmra.mrb[6].mxu0 %vm417_vm13, %v416_v36  ;;  %v707_v36 = vld [vmem:[%s2366_s5] sm:$0xff] }
 0x271   :  { %v106_v59 = vpop.permute.xlu0 %105 }
 0x272   :  { %v537_v43 = vpop.permute.xlu1 %536  ;;  %v203_v5 = vadd.f32 %v1517_v39, %v106_v59 }
 0x276   :  { %v541_v44 = vpop.permute.xlu1 %540 }
 0x27b   :  { %v529_v47 = vpop.permute.xlu1 %528 }
 0x280   :  { %v101_v49 = vpop.permute.xlu1 %100 }
 0x281   :  { %v198_v8 = vadd.f32 %v197_v40, %v101_v49 }
 0x285   :  { %v545_v51 = vpop.permute.xlu1 %544 }
 0x289   :  { %v549_v3 = vpop.permute.xlu1 %548 }
 0x33f   :  { %v1556_v52 = vpop.f32.mrb[4].mxu0 }
 0x340   :  { %v532_v53 = vmul.f32 %v1556_v52, %v521_v41  ;;  %v496_v54 = vpop.f32.mrb[5].mxu0 }
 0x341   :  { %v531_v55 = vmul.f32 %v517_v46, %v496_v54 }
 0x342   :  { %v552_v57 = vadd.f32 %v541_v44, %v532_v53 }
 0x343   :  { %v551_v60 = vadd.f32 %v537_v43, %v531_v55  ;;  %v1559_v61 = vpop.f32.mrb[6].mxu0 }
 0x344   :  { %v556_v63 = vadd.f32 %v552_v57, %v193_v56  ;;  %v534_v0 = vmul.f32 %v1559_v61, %v529_v47  ;;  %v506_v1 = vpop.f32.mrb[7].mxu0  ;;  %v708_v56 = vld [vmem:[%s2366_s5 + $0x8] sm:$0xff] }
 0x345   :  { %v555_v2 = vadd.f32 %v551_v60, %v188_v58  ;;  %v533_v4 = vmul.f32 %v525_v48, %v506_v1 }
 0x346   :  { %vm560_vm1 = vcmp.ge.f32.partialorder %v556_v63, 0.0  ;;  %v564_v6 = vmul.f32 0.1, %v556_v63  ;;  %v554_v7 = vadd.f32 %v549_v3, %v534_v0 }
 0x347   :  { %vm559_vm2 = vcmp.ge.f32.partialorder %v555_v2, 0.0  ;;  %v563_v9 = vmul.f32 0.1, %v555_v2  ;;  %v553_v11 = vadd.f32 %v545_v51, %v533_v4 }
 0x348   :  { %v568_v12 = vsel %vm560_vm1, %v556_v63, %v564_v6  ;;  %v558_v20 = vadd.f32 %v554_v7, %v203_v5 }
 0x349   :  { %v567_v22 = vsel %vm559_vm2, %v555_v2, %v563_v9  ;;  %v557_v23 = vadd.f32 %v553_v11, %v198_v8  ;;  %v572_v24 = vmul.f32 %v568_v12, %v2091_v45 }
 0x34a   :  { %vm562_vm4 = vcmp.ge.f32.partialorder %v558_v20, 0.0  ;;  %v566_v25 = vmul.f32 0.1, %v558_v20  ;;  %v571_v14 = vmul.f32 %v567_v22, %v2091_v45  ;;  %v836_v22 = vld [vmem:[%s2367_s6] sm:$0xff] }
 0x34b   :  { %vm561_vm7 = vcmp.ge.f32.partialorder %v557_v23, 0.0  ;;  %v565_v15 = vmul.f32 0.1, %v557_v23  ;;  %1610 = vmatprep.mubr.msk.f32.mxu0 %vm838_vm10, %v836_v22 }
 0x34c   :  { %v570_v26 = vsel %vm562_vm4, %v558_v20, %v566_v25  ;;  %v1820_v27 = vpack.i.bf16 %v572_v24, %v571_v14  ;;  %v1691_v28 = vpack.c.bf16 %v572_v24, %v571_v14 }
 0x34d   :  { %v569_v30 = vsel %vm561_vm7, %v557_v23, %v565_v15  ;;  %v574_v31 = vmul.f32 %v570_v26, %v2091_v45 }
 0x34e   :  { %1821 = vrot.lane.b32.xlu0 %v1820_v27, %s1901_s24  ;;  %1692 = vmatprep.subr.bf16.mxu1 %v1691_v28  ;;  %v573_v32 = vmul.f32 %v569_v30, %v2091_v45  ;;  %v837_v30 = vld [vmem:[%s2367_s6 + $0x8] sm:$0xff] }
 0x34f   :  { %1694 = vmatpush3.bf16.msra.mxu1 %v1691_v28 }
 0x350   :  { %v1825_v33 = vpack.i.bf16 %v574_v31, %v573_v32  ;;  %v1695_v34 = vpack.c.bf16 %v574_v31, %v573_v32  ;;  %v1910_v31 = vmov 0.0|0.0  }
 0x352   :  { %1831 = vrot.lane.b32.xlu0 %v1820_v27, %s1904_s17  ;;  %1826 = vrot.lane.b32.xlu1 %v1825_v33, %s1901_s24 }
 0x353   :  { %1696 = vmatprep.subr.bf16.mxu1 %v1695_v34 }
 0x354   :  { %1698 = vmatpush3.bf16.msra.mxu1 %v1695_v34 }
 0x356   :  { %1836 = vrot.lane.b32.xlu1 %v1825_v33, %s1904_s17  ;;  %791 = vperm.xlu0 %1840, %v2200_v37  }
 0x357   :  { %1569 = vmatmul.mubr.msk.f32.vlgmr.msra.gmra.mrb[4].mxu1 %vm589_vm0, %v578_v35  ;;  %vm1913_vm0 = vmmov 1  }
 0x358   :  { %1595 = vmatprep.mubr.msk.f32.mxu1 %vm417_vm13, %v707_v36  ;;  %vm2316_vm1 = vmpackc.low %vm1913_vm0, %vm2058_vm6 }
 0x35a   :  { %795 = vperm.xlu1 %1841, %v2205_v38   ;;  %1843 = vset.pattern.permute.xlu0 %v1905_v13 }
 0x35b   :  { %805 = vperm.xlu0 %1843, %v2205_v38  }
 0x35e   :  { %1842 = vset.pattern.permute.xlu1 %v1905_v13 }
 0x35f   :  { %801 = vperm.xlu1 %1842, %v2200_v37   ;;  %1854 = vset.pattern.permute.xlu0 %v1907_v17 }
 0x360   :  { %921 = vperm.xlu0 %1854, %v2200_v37  }
 0x363   :  { %1855 = vset.pattern.permute.xlu1 %v1907_v17 }
 0x364   :  { %1857 = vset.pattern.permute.xlu0 %v1908_v18 }
 0x365   :  { %586 = vperm.xlu0 %1857, %v2205_v38  }
 0x369   :  { %1869 = vset.pattern.permute.xlu0 %v1903_v10 }
 0x3c0   :  { %v1822_v39 = vpop.permute.xlu0 %1821 }
 0x3c1   :  { %v1824_v40 = vunpack.i.h.bf16 %v1822_v39  ;;  %v1823_v41 = vunpack.i.l.bf16 %v1822_v39 }
 0x3c3   :  { %v1699_v42 = vpack.c.bf16 %v1824_v40, %v1823_v41 }
 0x3c4   :  { %v1827_v43 = vpop.permute.xlu1 %1826  ;;  %v1832_v48 = vpop.permute.xlu0 %1831 }
 0x3c5   :  { %v1829_v44 = vunpack.i.h.bf16 %v1827_v43  ;;  %v1828_v46 = vunpack.i.l.bf16 %v1827_v43  ;;  %1701 = vmatprep.subr.msk.bf16.mxu1 %vm2139_vm14, %v1699_v42  ;;  %v1834_v49 = vunpack.i.h.bf16 %v1832_v48  ;;  %v1833_v50 = vunpack.i.l.bf16 %v1832_v48 }
 0x3c6   :  { %1704 = vmatpush3.bf16.msk.msra.mxu1 %vm2139_vm14, %v1699_v42 }
 0x3c7   :  { %v1705_v47 = vpack.c.bf16 %v1829_v44, %v1828_v46  ;;  %v1719_v52 = vpack.c.bf16 %v1834_v49, %v1833_v50 }
 0x3c8   :  { %v1837_v51 = vpop.permute.xlu1 %1836 }
 0x3c9   :  { %1707 = vmatprep.subr.msk.bf16.mxu1 %vm2139_vm14, %v1705_v47  ;;  %v1839_v53 = vunpack.i.h.bf16 %v1837_v51  ;;  %v1838_v54 = vunpack.i.l.bf16 %v1837_v51 }
 0x3ca   :  { %1710 = vmatpush3.bf16.msk.msra.mxu1 %vm2139_vm14, %v1705_v47 }
 0x3cb   :  { %1712 = vmatprep.subr.bf16.mxu1 %v1691_v28  ;;  %v1725_v55 = vpack.c.bf16 %v1839_v53, %v1838_v54 }
 0x3ce   :  { %1714 = vmatpush3.bf16.msra.mxu1 %v1691_v28 }
 0x3cf   :  { %1716 = vmatprep.subr.bf16.mxu1 %v1695_v34 }
 0x3d2   :  { %1718 = vmatpush3.bf16.msra.mxu1 %v1695_v34 }
 0x3d3   :  { %1721 = vmatprep.subr.msk.bf16.mxu1 %vm2153_vm15, %v1719_v52 }
 0x3d5   :  { %v792_v60 = vpop.permute.xlu0 %791 }
 0x3d6   :  { %1724 = vmatpush3.bf16.msk.msra.mxu1 %vm2153_vm15, %v1719_v52 }
 0x3d7   :  { %1727 = vmatprep.subr.msk.bf16.mxu1 %vm2153_vm15, %v1725_v55 }
 0x3d9   :  { %v796_v59 = vpop.permute.xlu1 %795 }
 0x3da   :  { %1730 = vmatpush3.bf16.msk.msra.mxu1 %vm2153_vm15, %v1725_v55  ;;  %v806_v1 = vpop.permute.xlu0 %805 }
 0x3db   :  { %1750 = vmatprep.subr.bf16.mxu1 %v1910_v31 }
 0x3dd   :  { %1596 = vmatmul.mubr.msk.f32.vlgmr.msra.gmra.mrb[6].mxu1 %vm417_vm13, %v708_v56  ;;  %vm1911_vm13 = vmmov 0  }
 0x3de   :  { %v802_v0 = vpop.permute.xlu1 %801 }
 0x3df   :  { %v922_v34 = vpop.permute.xlu0 %921 }
 0x3e4   :  { %v587_v36 = vpop.permute.xlu0 %586 }
 0x42a   :  { %v2239_v57 = vpop.f32.mrb[4].mxu1 }
 0x42b   :  { %v2241_v58 = vpop.f32.mrb[5].mxu1  ;;  %v668_v42 = vadd.f32 %v2239_v57, %v587_v36  ;;  %v1912_v57 = vmov 0.0  }
 0x42c   :  { %1632 = vmatprep.mubr.msk.f32.mxu1 %vm1911_vm13, %v1912_v57 }
 0x4b0   :  { %v1597_v61 = vpop.f32.mrb[6].mxu1 }
 0x4b1   :  { %v799_v62 = vmul.f32 %v1597_v61, %v796_v59  ;;  %v781_v63 = vpop.f32.mrb[7].mxu1 }
 0x4b2   :  { %v798_v2 = vmul.f32 %v792_v60, %v781_v63 }
 0x4b3   :  { %v809_v3 = vadd.f32 %v806_v1, %v799_v62 }
 0x4b4   :  { %v808_v4 = vadd.f32 %v802_v0, %v798_v2 }
 0x4b5   :  { %vm811_vm8 = vcmp.ge.f32.partialorder %v809_v3, 0.0  ;;  %v813_v5 = vmul.f32 0.1, %v809_v3 }
 0x4b6   :  { %vm810_vm9 = vcmp.ge.f32.partialorder %v808_v4, 0.0  ;;  %v812_v6 = vmul.f32 0.1, %v808_v4 }
 0x4b7   :  { %v815_v7 = vsel %vm811_vm8, %v809_v3, %v813_v5 }
 0x4b8   :  { %v817_v8 = vmul.f32 %v815_v7, %v2091_v45  ;;  %v814_v9 = vsel %vm810_vm9, %v808_v4, %v812_v6 }
 0x4b9   :  { %v816_v11 = vmul.f32 %v814_v9, %v2091_v45 }
 0x4bb   :  { %v1844_v12 = vpack.i.bf16 %v817_v8, %v816_v11  ;;  %v1737_v20 = vpack.c.bf16 %v817_v8, %v816_v11  ;;  %v1235_v11 = vld [vmem:[%s2374_s13] sm:$0xff] }
 0x4bd   :  { %1845 = vrot.lane.b32.xlu1 %v1844_v12, %s1901_s24 }
 0x4c1   :  { %1850 = vrot.lane.b32.xlu1 %v1844_v12, %s1904_s17 }
 0x4c5   :  { %925 = vperm.xlu1 %1855, %v2205_v38  }
 0x4c9   :  { %1856 = vset.pattern.permute.xlu1 %v1908_v18 }
 0x4ca   :  { %581 = vperm.xlu1 %1856, %v2200_v37  }
 0x4ce   :  { %1858 = vset.pattern.permute.xlu1 %v1909_v19 }
 0x4cf   :  { %931 = vperm.xlu1 %1858, %v2200_v37  }
 0x4d3   :  { %935 = vperm.xlu1 %1858, %v2205_v38  }
 0x4d7   :  { %1870 = vset.pattern.permute.xlu1 %v1905_v13 }
 0x52f   :  { %v1846_v23 = vpop.permute.xlu1 %1845 }
 0x530   :  { %v1848_v24 = vunpack.i.h.bf16 %v1846_v23  ;;  %v1847_v25 = vunpack.i.l.bf16 %v1846_v23 }
 0x532   :  { %v1731_v14 = vpack.c.bf16 %v1848_v24, %v1847_v25 }
 0x533   :  { %v1851_v15 = vpop.permute.xlu1 %1850 }
 0x534   :  { %v1853_v26 = vunpack.i.h.bf16 %v1851_v15  ;;  %v1852_v27 = vunpack.i.l.bf16 %v1851_v15  ;;  %1733 = vmatprep.subr.msk.bf16.mxu0 %vm2139_vm14, %v1731_v14 }
 0x535   :  { %1736 = vmatpush3.bf16.msk.msra.mxu0 %vm2139_vm14, %v1731_v14 }
 0x536   :  { %1738 = vmatprep.subr.bf16.mxu0 %v1737_v20  ;;  %v1741_v28 = vpack.c.bf16 %v1853_v26, %v1852_v27 }
 0x539   :  { %1740 = vmatpush3.bf16.msra.mxu0 %v1737_v20 }
 0x53a   :  { %1743 = vmatprep.subr.msk.bf16.mxu0 %vm2153_vm15, %v1741_v28 }
 0x53d   :  { %1746 = vmatpush3.bf16.msk.msra.mxu0 %vm2153_vm15, %v1741_v28 }
 0x53e   :  { %1747 = vmatprep.subr.bf16.mxu0 %v1910_v31 }
 0x540   :  { %1611 = vmatmul.mubr.msk.f32.vlgmr.msra.gmra.mrb[8].mxu0 %vm838_vm10, %v837_v30 }
 0x541   :  { %1617 = vmatprep.mubr.msk.f32.mxu0 %vm1911_vm13, %v1912_v57 }
 0x544   :  { %v926_v32 = vpop.permute.xlu1 %925 }
 0x549   :  { %v582_v33 = vpop.permute.xlu1 %581 }
 0x54a   :  { %v663_v44 = vadd.f32 %v2241_v58, %v582_v33  ;;  %v950_v58 = vld [vmem:[%s2373_s12] sm:$0xff] }
 0x54e   :  { %v932_v35 = vpop.permute.xlu1 %931 }
 0x552   :  { %v936_v40 = vpop.permute.xlu1 %935 }
 0x613   :  { %v1612_v37 = vpop.f32.mrb[8].mxu0 }
 0x614   :  { %v929_v38 = vmul.f32 %v1612_v37, %v926_v32  ;;  %v911_v39 = vpop.f32.mrb[9].mxu0  ;;  %v1248_v37 = vld [vmem:[%s2376_s15] sm:$0xff]  ;;  %s1914_s15 = smov 109  }
 0x615   :  { %v928_v41 = vmul.f32 %v922_v34, %v911_v39 }
 0x616   :  { %v939_v43 = vadd.f32 %v936_v40, %v929_v38 }
 0x617   :  { %v938_v46 = vadd.f32 %v932_v35, %v928_v41 }
 0x618   :  { %v941_v47 = vadd.f32 %v939_v43, %v668_v42  ;;  %v1258_v42 = vld [vmem:[%s2375_s14] sm:$0xff] }
 0x619   :  { %v940_v48 = vadd.f32 %v938_v46, %v663_v44 }
 0x61a   :  { %vm943_vm11 = vcmp.ge.f32.partialorder %v941_v47, 0.0  ;;  %v945_v49 = vmul.f32 0.1, %v941_v47 }
 0x61b   :  { %vm942_vm12 = vcmp.ge.f32.partialorder %v940_v48, 0.0  ;;  %v944_v50 = vmul.f32 0.1, %v940_v48 }
 0x61c   :  { %v947_v51 = vsel %vm943_vm11, %v941_v47, %v945_v49 }
 0x61d   :  { %v946_v52 = vsel %vm942_vm12, %v940_v48, %v944_v50  ;;  %v949_v53 = vmul.f32 %v947_v51, %v2091_v45 }
 0x61e   :  { %v948_v54 = vmul.f32 %v946_v52, %v2091_v45 }
 0x620   :  { %v1864_v55 = vpack.i.bf16 %v949_v53, %v948_v54  ;;  %v1748_v56 = vpack.c.bf16 %v949_v53, %v948_v54 }
 0x622   :  { %1865 = vrot.lane.b32.xlu1 %v1864_v55, %s1904_s17  ;;  %1860 = vrot.lane.b32.xlu0 %v1864_v55, %s1901_s24 }
 0x623   :  { %1749 = vmatpush3.bf16.msra.mxu0 %v1748_v56 }
 0x624   :  { %1761 = vmatprep.subr.bf16.mxu0 %v1910_v31 }
 0x626   :  { %1124 = vperm.xlu0 %1869, %v950_v58   ;;  %1129 = vperm.xlu1 %1870, %v950_v58  }
 0x62a   :  { %1872 = vset.pattern.permute.xlu0 %v1908_v18  ;;  %1871 = vset.pattern.permute.xlu1 %v1907_v17  ;;  %v1049_v17 = vld [vmem:[%s2370_s9] sm:$0xff] }
 0x62b   :  { %v951_v18 = vld [vmem:[%s2372_s11] sm:$0xff] }
 0x694   :  { %v1861_v59 = vpop.permute.xlu0 %1860  ;;  %v1866_v63 = vpop.permute.xlu1 %1865 }
 0x695   :  { %v1863_v60 = vunpack.i.h.bf16 %v1861_v59  ;;  %v1862_v61 = vunpack.i.l.bf16 %v1861_v59  ;;  %v1868_v0 = vunpack.i.h.bf16 %v1866_v63  ;;  %v1867_v1 = vunpack.i.l.bf16 %v1866_v63 }
 0x697   :  { %v1751_v62 = vpack.c.bf16 %v1863_v60, %v1862_v61  ;;  %v1758_v2 = vpack.c.bf16 %v1868_v0, %v1867_v1 }
 0x699   :  { %1753 = vmatpush3.bf16.msk.msra.mxu1 %vm2139_vm14, %v1751_v62  ;;  %vm957_vm14 = vcmask 130048  }
 0x69a   :  { %1754 = vmatprep.subr.bf16.mxu1 %v1910_v31  ;;  %1618 = vmatmul.mubr.msk.f32.vlgmr.msra.gmra.mrb[10].mxu0 %vm957_vm14, %v951_v18 }
 0x69b   :  { %1641 = vmatprep.mubr.msk.f32.mxu0 %vm1911_vm13, %v1912_v57 }
 0x69d   :  { %1756 = vmatpush3.bf16.msra.mxu1 %v1748_v56 }
 0x69e   :  { %1757 = vmatprep.subr.bf16.mxu1 %v1910_v31 }
 0x6a1   :  { %1760 = vmatpush3.bf16.msk.msra.mxu1 %vm2153_vm15, %v1758_v2 }
 0x6a4   :  { %1633 = vmatmul.mubr.msk.f32.vlgmr.msra.gmra.mrb[8].mxu1 %vm838_vm10, %v1049_v17 }
 0x6a5   :  { %v1125_v21 = vpop.permute.xlu0 %1124  ;;  %v1130_v29 = vpop.permute.xlu1 %1129 }
 0x76d   :  { %v1027_v16 = vpop.f32.mrb[10].mxu0 }
 0x76e   :  { %v1619_v22 = vpop.f32.mrb[11].mxu0 }
 0x777   :  { %v1119_v3 = vpop.f32.mrb[8].mxu1 }
 0x778   :  { %v1127_v4 = vmul.f32 %v1125_v21, %v1119_v3  ;;  %v1634_v5 = vpop.f32.mrb[9].mxu1 }
 0x77a   :  { %v1132_v6 = vadd.f32 %v1130_v29, %v1127_v4 }
 0x77c   :  { %vm1133_vm15 = vcmp.ge.f32.partialorder %v1132_v6, 0.0  ;;  %v1134_v7 = vmul.f32 0.1, %v1132_v6 }
 0x77e   :  { %v1135_v8 = vsel %vm1133_vm15, %v1132_v6, %v1134_v7 }
 0x77f   :  { %v1136_v9 = vmul.f32 %v1135_v8, %v2091_v45 }
 0x781   :  { %1142 = vrot.lane.b32.xlu0 %v1136_v9, %s1904_s17  ;;  %1138 = vrot.lane.b32.xlu1 %v1136_v9, %s1901_s24 }
 0x785   :  { %954 = vperm.xlu0 %1872, %v950_v58   ;;  %1221 = vperm.xlu1 %1871, %v950_v58  }
 0x789   :  { %1873 = vset.pattern.permute.xlu1 %v1909_v19  ;;  %1875 = vset.pattern.permute.xlu0 %v1905_v13  ;;  %v1146_v13 = vld [vmem:[%s2371_s10] sm:$0xff] }
 0x78a   :  { %1226 = vperm.xlu1 %1873, %v950_v58   ;;  %1243 = vperm.xlu0 %1875, %v1235_v11  }
 0x78e   :  { %1874 = vset.pattern.permute.xlu1 %v1903_v10  ;;  %1876 = vset.pattern.permute.xlu0 %v1903_v10 }
 0x78f   :  { %1238 = vperm.xlu1 %1874, %v1235_v11   ;;  %1261 = vperm.xlu0 %1876, %v1248_v37  }
 0x7f3   :  { %v1139_v19 = vpop.permute.xlu1 %1138  ;;  %v1143_v10 = vpop.permute.xlu0 %1142 }
 0x7f4   :  { %v1762_v20 = vpack.c.bf16 %v1136_v9, %v1139_v19 }
 0x7f6   :  { %1764 = vmatpush3.bf16.msk.msra.mxu0 %vm2316_vm1, %v1762_v20 }
 0x7f7   :  { %1639 = vmatprep.subr.mxu0 %v1912_v57 }
 0x7fa   :  { %1640 = vmatpush3.msk.msra.mxu0 %vm73_vm5, %v1143_v10 }
 0x7fb   :  { %1642 = vmatmul.mubr.msk.f32.vlgmr.msra.gmra.mrb[12].mxu0 %vm219_vm3, %v1146_v13  ;;  %1765 = vmatprep.subr.bf16.mxu0 %v1910_v31 }
 0x7fc   :  { %1650 = vmatprep.mubr.msk.f32.mxu0 %vm1911_vm13, %v1912_v57 }
 0x804   :  { %v1222_v23 = vpop.permute.xlu1 %1221  ;;  %v955_v24 = vpop.permute.xlu0 %954 }
 0x805   :  { %v1028_v27 = vadd.f32 %v1027_v16, %v955_v24 }
 0x809   :  { %v1227_v14 = vpop.permute.xlu1 %1226  ;;  %v1244_v35 = vpop.permute.xlu0 %1243 }
 0x80e   :  { %v1239_v33 = vpop.permute.xlu1 %1238 }
 0x8ce   :  { %v1216_v25 = vpop.f32.mrb[12].mxu0 }
 0x8cf   :  { %v1224_v15 = vmul.f32 %v1222_v23, %v1216_v25  ;;  %v1643_v26 = vpop.f32.mrb[13].mxu0 }
 0x8d1   :  { %v1229_v28 = vadd.f32 %v1227_v14, %v1224_v15 }
 0x8d3   :  { %v1230_v30 = vadd.f32 %v1229_v28, %v1028_v27 }
 0x8d5   :  { %v1232_v32 = vmul.f32 0.1, %v1230_v30  ;;  %vm1231_vm6 = vcmp.ge.f32.partialorder %v1230_v30, 0.0 }
 0x8d7   :  { %v1233_v34 = vsel %vm1231_vm6, %v1230_v30, %v1232_v32 }
 0x8d8   :  { %v1234_v31 = vmul.f32 %v1233_v34, %v2091_v45 }
 0x8da   :  { %v1241_v36 = vmul.f32 %v1239_v33, %v1234_v31 }
 0x8dc   :  { %v1246_v38 = vadd.f32 %v1244_v35, %v1241_v36 }
 0x8de   :  { %v1247_v39 = vmul.f32 %v1246_v38, %v2091_v45  ;;  %v1262_v45 = vpop.permute.xlu0 %1261 }
 0x8e0   :  { %1250 = vrot.lane.b32.xlu1 %v1247_v39, %s1901_s24  ;;  %s1915_s24 = smov [#allocation2]  }
 0x8e1   :  { %s1355_s18 = sshll.u32 %s1915_s24, 4  ;;  %s1356_s18 = int_to_ptr.vmem [resolvable:$true] %s1355_s18 }
 0x8e2   :  { %s1877_s14 = scalar_lea.vmem %s1356_s18, 256  ;;  %p1882_p1 = scmp.lt.s32.totalorder %s1356_s18, %s1356_s18 }
 0x8e3   :  { %p1878_p0 = scmp.ne.s32.totalorder %s1356_s18, %s1877_s14  ;;  %p1883_p2 = scmp.lt.s32.totalorder %s1877_s14, %s1877_s14 }
 0x8e4   :  { %1254 = vrot.lane.b32.xlu1 %v1247_v39, %s1904_s17 }
 0x8e5   :  { %p1884_p3 = por %p1883_p2, %p1882_p1 }
 0x8e7   :  { %p1885_p4 = pnand %p1884_p3, %p1878_p0 }
 0x952   :  { %v1251_v40 = vpop.permute.xlu1 %1250 }
 0x953   :  { %v1766_v41 = vpack.c.bf16 %v1247_v39, %v1251_v40 }
 0x955   :  { %1768 = vmatpush3.bf16.msk.msra.mxu0 %vm2316_vm1, %v1766_v41 }
 0x956   :  { %1648 = vmatprep.subr.mxu0 %v1912_v57  ;;  %v1255_v43 = vpop.permute.xlu1 %1254 }
 0x959   :  { %1649 = vmatpush3.msk.msra.mxu0 %vm73_vm5, %v1255_v43 }
 0x95a   :  { %1651 = vmatmul.mubr.msk.f32.vlgmr.msra.gmra.mrb[14].mxu0 %vm219_vm3, %v1258_v42 }
 0xa2d   :  { %v1333_v44 = vpop.f32.mrb[14].mxu0 }
 0xa2e   :  { %v1334_v46 = vadd.f32 %v1333_v44, %v1262_v45  ;;  %v1652_v47 = vpop.f32.mrb[15].mxu0 }
 0xa30   :  { %v1338_v48 = vmul.f32 0.1, %v1334_v46  ;;  %vm1337_vm2 = vcmp.ge.f32.partialorder %v1334_v46, 0.0 }
 0xa32   :  { %v1339_v49 = vsel %vm1337_vm2, %v1334_v46, %v1338_v48 }
 0xa33   :  { %1341 = vrot.lane.b32.xlu1 %v1339_v49, %s1904_s17 }
 0xa37   :  { %1345 = vrot.lane.b32.xlu1 %v1339_v49, %s1914_s15 }
 0xaa5   :  { %v1342_v50 = vpop.permute.xlu1 %1341 }
 0xaa6   :  { %1344 = vst.msk [vmem:[#allocation2] sm:$0xff] %vm957_vm14, %v1342_v50 }
 0xaa9   :  { %v1346_v51 = vpop.permute.xlu1 %1345 }
 0xaaa   :  { %1349 = vst.msk [vmem:[#allocation2 + $0x8] sm:$0xff] %vm957_vm14, %v1346_v51 }
 0xaab   :  { %1888 = shalt.err (!%p1885_p4)
}
 0xaac   :  { %s1889_s20 = scalar_lea.hbm %s2377_s16, 256 }
 0xaad   :  { %p1890_p5 = scmp.ne.s32.totalorder %s2377_s16, %s1889_s20  ;;  %p1893_p6 = scmp.lt.u32.totalorder %s1889_s20, %s2377_s16 }
 0xaaf   :  { %p1895_p7 = pnand %p1893_p6, %p1890_p5 }
 0xab1   :  { %1898 = shalt.err (!%p1895_p7)
}
 0xab2   :  { %s1916_s8 = smov 128   ;;  %s1917_s5 = smov 8  }
 0xab3   :  { %1361 = dma.vmem_to_hbm [thread:$0]  %s1356_s18, 256, %s2377_s16, [#allocation3], %s1916_s8, %s1916_s8, %s1917_s5  }
 0xab4   :  { %1899 = dma.done.wait [#allocation3], 256  }
 0xab5   :  { %1900 = vsyncadd [#allocation3], 4294967040 }
 0xab6   :  { %1365 = vsyncpa [#allocation3], 1 }

</bundles_post_ra>
